<compile_context>
chip_gen: v6e
topology: v6e:2x2x1
jax: 0.10.0
libtpu: 0.0.40
codegen_flags: <defaults>
</compile_context>

<pallas_src>
import jax
import jax.numpy as jnp
from jax.experimental import pallas as pl
from jax.experimental.pallas import tpu as pltpu


# ---------------------------------------------------------------------------
# Kernel 1: xw1 = x @ w1_folded (reassociated first MLP layer), emitted in bf16
# so the big N x N aggregation matmul runs on the bf16 MXU path.
# ---------------------------------------------------------------------------
def xw1_kernel(x_ref, w1_ref, o_ref):
    o_ref[...] = jnp.dot(x_ref[...], w1_ref[...],
                         preferred_element_type=jnp.float32).astype(o_ref.dtype)


# ---------------------------------------------------------------------------
# Kernel 2: grid = (row tiles i [parallel], neighbor tiles k [arbitrary]).
#   k < cnt[i]:  agg_i += adj[i, cols[i,k]] @ xw1[cols[i,k]]   (bf16 x bf16 -> f32)
#   k == last:
#     h1      = relu((1+eps) * xw1[i] + agg_i + b1)
#     h2      = relu(h1 @ w2 + b2)                 (dropout = identity at inference)
#     part[i] = onehot_pool[:, i-tile] @ h2        (per-tile sum-pool partial)
# cnt/cols are scalar-prefetched; all-zero adjacency tiles are skipped: their
# index_map re-points at the previously fetched tile (no re-DMA) and the compute
# is gated off with pl.when.
# ---------------------------------------------------------------------------
def make_gin_tile_kernel(tile_k, resident):
    def gin_tile_kernel(cnt_ref, cols_ref, eps_ref, xw1_ref, xw1_i_ref, adj_ref,
                        pool_ref, b1_ref, w2_ref, b2_ref, part_ref, agg_ref):
        i = pl.program_id(0)
        k = pl.program_id(1)

        @pl.when(k == 0)
        def _():
            agg_ref[...] = jnp.zeros_like(agg_ref)

        @pl.when(k < cnt_ref[i])
        def _():
            if resident:
                # xw1 is fully resident in VMEM; slice the needed column tile.
                start = pl.multiple_of(cols_ref[i, k] * tile_k, 128)
                rhs = xw1_ref[pl.ds(start, tile_k), :]
            else:
                rhs = xw1_ref[...]
            agg_ref[...] += jnp.dot(adj_ref[...], rhs,
                                    preferred_element_type=jnp.float32)

        @pl.when(k == pl.num_programs(1) - 1)
        def _():
            one_plus_eps = 1.0 + eps_ref[0]
            h1 = jnp.maximum(
                one_plus_eps * xw1_i_ref[...].astype(jnp.float32)
                + agg_ref[...] + b1_ref[...], 0.0)
            h2 = jnp.maximum(
                jnp.dot(h1, w2_ref[...], preferred_element_type=jnp.float32)
                + b2_ref[...], 0.0)
            part_ref[0] = jnp.dot(pool_ref[...], h2,
                                  preferred_element_type=jnp.float32)

    return gin_tile_kernel


# ---------------------------------------------------------------------------
# Kernel 3 (head): sum the per-tile pool partials, scale by 1/|V_g|,
# final Linear (lane-padded to 128) + log_softmax.  Output is lane-dense.
# ---------------------------------------------------------------------------
def head_kernel(part_ref, invc_ref, wl_ref, bl_ref, out_ref):
    pooled = jnp.sum(part_ref[...], axis=0) * invc_ref[...]          # [G, H]
    logits = jnp.dot(pooled, wl_ref[...],
                     preferred_element_type=jnp.float32) + bl_ref[...]
    m = jnp.max(logits, axis=-1, keepdims=True)
    lse = jnp.log(jnp.sum(jnp.exp(logits - m), axis=-1, keepdims=True)) + m
    out_ref[...] = logits - lse


# ---------------------------------------------------------------------------
# Host-side helpers / wrapper
# ---------------------------------------------------------------------------
def fold_bn(w, b, gamma, beta, mean, var, bn_eps=1e-5):
    """Fold inference-mode BatchNorm1d into the preceding Linear."""
    scale = gamma / jnp.sqrt(var + bn_eps)
    return w * scale[None, :], b * scale + (beta - mean * scale)


def _round_up(x, m):
    return (x + m - 1) // m * m


def _pick_tile(npad, want):
    """Largest multiple of 128 that is <= want and divides npad (npad % 128 == 0)."""
    t = max(128, min(want, npad))
    t = (t // 128) * 128
    while npad % t:
        t -= 128
    return t


def gin_forward(x, adj, batch, num_graphs, params, *, tile_m=128, tile_k=512):
    """x: [N, Fin] f32, adj: [N, N] f32 (dense 0/1 adj_t), batch: [N] int graph ids."""
    N, Fin = x.shape
    G = num_graphs
    H2 = params["w1"].shape[1]       # 2 * hidden
    H = params["w2"].shape[1]        # hidden
    C = params["wl"].shape[1]        # out_channels
    CPAD = 128                       # lane-dense output width

    w1, b1 = fold_bn(params["w1"], params["b1"], params["bn1_g"], params["bn1_b"],
                     params["bn1_m"], params["bn1_v"])
    w2, b2 = fold_bn(params["w2"], params["b2"], params["bn2_g"], params["bn2_b"],
                     params["bn2_m"], params["bn2_v"])

    # Pad N to a multiple of 128; tile sizes are then chosen as divisors of npad.
    npad = _round_up(N, 128)
    tile_m = _pick_tile(npad, tile_m)
    tile_k = _pick_tile(npad, tile_k)
    nt_m = npad // tile_m
    nt_k = npad // tile_k

    # adj / pool built directly at padded size (no f32 [npad, npad] temporary).
    # adj entries are 0/1 -> exact in bf16.  Padded adj rows/cols and padded pool
    # columns are zero, so padding contributes nothing to the result.
    x_p = jnp.zeros((npad, Fin), jnp.float32).at[:N].set(x)
    adj_p = jnp.zeros((npad, npad), jnp.bfloat16).at[:N, :N].set(
        adj.astype(jnp.bfloat16))
    batch_p = jnp.full((npad,), -1, jnp.int32).at[:N].set(batch.astype(jnp.int32))
    pool_p = (batch_p[None, :] == jnp.arange(G, dtype=jnp.int32)[:, None]
              ).astype(jnp.float32)                                   # [G, npad]
    inv_counts = (1.0 / jnp.maximum(pool_p.sum(axis=1), 1.0)
                  ).astype(jnp.float32)[:, None]                      # [G, 1]

    # Per-row-tile nonzero adjacency column tiles (block-diagonal batched graphs
    # make most tiles all-zero).  cols packs the nonzero column-tile indices first
    # and repeats the last valid one, so skipped steps re-point at an already
    # fetched tile (no extra DMA); cnt gates the compute inside the kernel.
    blk_nz = jnp.any(adj_p.reshape(nt_m, tile_m, nt_k, tile_k) != 0, axis=(1, 3))
    cnt = blk_nz.sum(axis=1).astype(jnp.int32)                        # [nt_m]
    order = jnp.argsort(jnp.logical_not(blk_nz), axis=1).astype(jnp.int32)
    last = order[jnp.arange(nt_m), jnp.maximum(cnt - 1, 0)]
    k_iota = jnp.arange(nt_k, dtype=jnp.int32)[None, :]
    cols = jnp.where(k_iota < cnt[:, None], order, last[:, None]).astype(jnp.int32)

    # Lane-pad the final Linear so the head-kernel output store is an unmasked [G,128].
    wl_pad = jnp.zeros((H, CPAD), jnp.float32).at[:, :C].set(params["wl"])
    bl_pad = jnp.full((1, CPAD), -1e30, jnp.float32).at[0, :C].set(params["bl"])

    vmem = pltpu.MemorySpace.VMEM
    smem = pltpu.MemorySpace.SMEM

    # --- stage 1: xw1 = x @ w1 (mem-bound K=Fin matmul; big row tile, bf16 out) --
    tile1 = _pick_tile(npad, 512)
    xw1 = pl.pallas_call(
        xw1_kernel,
        out_shape=jax.ShapeDtypeStruct((npad, H2), jnp.bfloat16),
        grid=(npad // tile1,),
        in_specs=[pl.BlockSpec((tile1, Fin), lambda i: (i, 0)),
                  pl.BlockSpec((Fin, H2), lambda i: (0, 0))],
        out_specs=pl.BlockSpec((tile1, H2), lambda i: (i, 0)),
        compiler_params=pltpu.CompilerParams(dimension_semantics=("parallel",)),
    )(x_p, w1)

    # --- stage 2: tiled aggregation + MLP + per-tile pool partials ---------------
    # Keep xw1 fully VMEM-resident (loaded once, never re-streamed per row tile)
    # when the double-buffered bf16 copy fits a conservative budget; otherwise
    # stream only the needed (nonzero) column tile per grid step.
    resident = (2 * npad * H2 * 2) <= (24 << 20)
    if resident:
        xw1_rhs_spec = pl.BlockSpec((npad, H2), lambda i, k, cnt, cols: (0, 0))
    else:
        xw1_rhs_spec = pl.BlockSpec((tile_k, H2),
                                    lambda i, k, cnt, cols: (cols[i, k], 0))

    est_vmem = ((2 * npad * H2 * 2 if resident else 2 * tile_k * H2 * 2)
                + 2 * tile_m * H2 * 2          # xw1 self-term tiles (bf16)
                + 2 * tile_m * tile_k * 2      # adj tiles (bf16, double-buffered)
                + 2 * G * tile_m * 4           # pool tiles
                + tile_m * H2 * 4              # f32 agg scratch
                + 2 * (H2 * H + H2 + H) * 4    # w2 / b1 / b2
                + 2 * G * H * 4)               # part output block
    cp = dict(dimension_semantics=("parallel", "arbitrary"))
    if est_vmem > (24 << 20):
        # v5e scoped-VMEM default is 16 MiB (v6e/v7x: 32 MiB); bump only when
        # needed, capped so the configuration still fits v7x's 64 MiB VMEM.
        cp["vmem_limit_bytes"] = int(min(60 << 20, 2 * est_vmem))

    part = pl.pallas_call(
        make_gin_tile_kernel(tile_k, resident),
        out_shape=jax.ShapeDtypeStruct((nt_m, G, H), jnp.float32),
        grid_spec=pltpu.PrefetchScalarGridSpec(
            num_scalar_prefetch=2,                                     # cnt, cols
            grid=(nt_m, nt_k),
            in_specs=[
                pl.BlockSpec(memory_space=smem),                       # eps (1,)
                xw1_rhs_spec,                                          # xw1 (agg RHS)
                pl.BlockSpec((tile_m, H2),
                             lambda i, k, cnt, cols: (i, 0)),          # xw1 self term
                pl.BlockSpec((tile_m, tile_k),
                             lambda i, k, cnt, cols: (i, cols[i, k])),  # adj tile
                pl.BlockSpec((G, tile_m),
                             lambda i, k, cnt, cols: (0, i)),          # one-hot pool
                pl.BlockSpec((1, H2), lambda i, k, cnt, cols: (0, 0)),  # b1
                pl.BlockSpec((H2, H), lambda i, k, cnt, cols: (0, 0)),  # w2
                pl.BlockSpec((1, H), lambda i, k, cnt, cols: (0, 0)),   # b2
            ],
            out_specs=pl.BlockSpec((1, G, H), lambda i, k, cnt, cols: (i, 0, 0)),
            scratch_shapes=[pltpu.VMEM((tile_m, H2), jnp.float32)]),
        compiler_params=pltpu.CompilerParams(**cp),
    )(cnt, cols, params["eps"], xw1, xw1, adj_p, pool_p,
      b1[None, :], w2, b2[None, :])

    # --- stage 3: finalize pool + Linear + log_softmax (lane-dense output) -------
    out_pad = pl.pallas_call(
        head_kernel,
        out_shape=jax.ShapeDtypeStruct((G, CPAD), jnp.float32),
        in_specs=[pl.BlockSpec(memory_space=vmem)] * 4,
        out_specs=pl.BlockSpec(memory_space=vmem),
    )(part, inv_counts, wl_pad, bl_pad)

    return out_pad[:, :C]


def reference_forward(x, adj, batch, num_graphs, params):
    """Pure-JAX f32 reference for sanity checking."""
    w1, b1 = fold_bn(params["w1"], params["b1"], params["bn1_g"], params["bn1_b"],
                     params["bn1_m"], params["bn1_v"])
    w2, b2 = fold_bn(params["w2"], params["b2"], params["bn2_g"], params["bn2_b"],
                     params["bn2_m"], params["bn2_v"])
    h = (1.0 + params["eps"][0]) * x + adj @ x
    h1 = jnp.maximum(h @ w1 + b1, 0.0)
    h2 = jnp.maximum(h1 @ w2 + b2, 0.0)
    onehot = (batch[None, :] == jnp.arange(num_graphs)[:, None]).astype(jnp.float32)
    pooled = (onehot @ h2) / jnp.maximum(onehot.sum(axis=1, keepdims=True), 1.0)
    logits = pooled @ params["wl"] + params["bl"]
    return jax.nn.log_softmax(logits, axis=1)


if __name__ == "__main__":
    key = jax.random.PRNGKey(0)
    ks = jax.random.split(key, 16)

    # Small shapes consistent with the module: Linear(4, 2H), hidden_channels=64,
    # out_channels=2, num_layers=1.  N=300 nodes / G=3 graphs -> 3x3 stage-2 grid.
    N, Fin, H, C, G = 300, 4, 64, 2, 3

    # Node features.
    x = jax.random.normal(ks[0], (N, Fin), dtype=jnp.float32)

    # Graph assignment: 100 nodes per graph (a PyG-style batch of disjoint graphs).
    batch = jnp.repeat(jnp.arange(G, dtype=jnp.int32), N // G)

    # Random block-diagonal adjacency (edges only within each graph), no self loops:
    # this is what a batched adj_t looks like and exercises the zero-tile skip.
    a = (jax.random.uniform(ks[1], (N, N)) < 0.25).astype(jnp.float32)
    same_graph = (batch[:, None] == batch[None, :]).astype(jnp.float32)
    adj = a * same_graph * (1.0 - jnp.eye(N, dtype=jnp.float32))

    # Deterministic synthetic parameters (not a checkpoint load).
    params = {
        "eps":   jnp.array([0.1], dtype=jnp.float32),
        "w1":    0.2 * jax.random.normal(ks[2], (Fin, 2 * H), dtype=jnp.float32),
        "b1":    0.1 * jax.random.normal(ks[3], (2 * H,), dtype=jnp.float32),
        "bn1_g": 1.0 + 0.1 * jax.random.normal(ks[4], (2 * H,), dtype=jnp.float32),
        "bn1_b": 0.1 * jax.random.normal(ks[5], (2 * H,), dtype=jnp.float32),
        "bn1_m": 0.05 * jax.random.normal(ks[6], (2 * H,), dtype=jnp.float32),
        "bn1_v": 1.0 + 0.1 * jax.random.uniform(ks[7], (2 * H,), dtype=jnp.float32),
        "w2":    0.2 * jax.random.normal(ks[8], (2 * H, H), dtype=jnp.float32),
        "b2":    0.1 * jax.random.normal(ks[9], (H,), dtype=jnp.float32),
        "bn2_g": 1.0 + 0.1 * jax.random.normal(ks[10], (H,), dtype=jnp.float32),
        "bn2_b": 0.1 * jax.random.normal(ks[11], (H,), dtype=jnp.float32),
        "bn2_m": 0.05 * jax.random.normal(ks[12], (H,), dtype=jnp.float32),
        "bn2_v": 1.0 + 0.1 * jax.random.uniform(ks[13], (H,), dtype=jnp.float32),
        "wl":    0.2 * jax.random.normal(ks[14], (H, C), dtype=jnp.float32),
        "bl":    0.1 * jax.random.normal(ks[15], (C,), dtype=jnp.float32),
    }

    # tile_k=128 here so nt_k=3 and the scalar-prefetched zero-tile skip is exercised.
    out = jax.block_until_ready(gin_forward(x, adj, batch, G, params,
                                            tile_m=128, tile_k=128))
    ref = reference_forward(x, adj, batch, G, params)
    assert out.shape == (G, C)
    err = float(jnp.max(jnp.abs(out - ref)))
    # bf16 aggregation operands -> looser tolerance than the pure-f32 reference.
    assert err < 5e-2, f"max abs diff {err}"
    print("KERNEL_OK")
</pallas_src>

<mosaic_0001>
module attributes {stable_mosaic.version = 11 : i64} {
  func.func @xw1_kernel(%arg0: i32, %arg1: memref<384x4xf32, #tpu.memory_space<vmem>>, %arg2: memref<4x128xf32, #tpu.memory_space<vmem>>, %arg3: memref<384x128xbf16, #tpu.memory_space<vmem>>) attributes {dimension_semantics = [#tpu.dimension_semantics<parallel>], iteration_bounds = array<i64: 1>, scalar_prefetch = 0 : i64, scratch_operands = 0 : i64, tpu.core_type = #tpu.core_type<tc>, window_params = [{transform_indices = @transform_0, window_bounds = array<i64: 384, 4>}, {pipeline_mode = #tpu.pipeline_mode<synchronous>, transform_indices = @transform_1, window_bounds = array<i64: 4, 128>}, {transform_indices = @transform_2, window_bounds = array<i64: 384, 128>}]} {
    %c0 = arith.constant 0 : index
    %c0_0 = arith.constant 0 : index
    %0 = vector.load %arg1[%c0, %c0_0] : memref<384x4xf32, #tpu.memory_space<vmem>>, vector<384x4xf32>
    %c0_1 = arith.constant 0 : index
    %c0_2 = arith.constant 0 : index
    %1 = vector.load %arg2[%c0_1, %c0_2] : memref<4x128xf32, #tpu.memory_space<vmem>>, vector<4x128xf32>
    %cst = arith.constant dense<0.000000e+00> : vector<384x128xf32>
    %2 = tpu.matmul %0, %1, %cst {dimension_numbers = #tpu.dot_dimension_numbers<[1], [0], [0], [1], [0, 0, 1, 1], [], []>} : vector<384x4xf32>, vector<4x128xf32>, vector<384x128xf32> -> vector<384x128xf32>
    %3 = arith.truncf %2 : vector<384x128xf32> to vector<384x128xbf16>
    %c0_3 = arith.constant 0 : index
    %c0_4 = arith.constant 0 : index
    %4 = vector.load %arg3[%c0_3, %c0_4] : memref<384x128xbf16, #tpu.memory_space<vmem>>, vector<384x128xbf16>
    tpu.vector_store %arg3[%c0_3, %c0_4], %3 {strides = array<i32>} : memref<384x128xbf16, #tpu.memory_space<vmem>>, vector<384x128xbf16>,
    return
  }
  func.func @transform_0(%arg0: i32) -> (i32, i32) {
    %c0_i32 = arith.constant 0 : i32
    %c0_i32_0 = arith.constant 0 : i32
    return %arg0, %c0_i32 : i32, i32
  }
  func.func @transform_1(%arg0: i32) -> (i32, i32) {
    %c0_i32 = arith.constant 0 : i32
    %c0_i32_0 = arith.constant 0 : i32
    %c0_i32_1 = arith.constant 0 : i32
    return %c0_i32, %c0_i32_0 : i32, i32
  }
  func.func @transform_2(%arg0: i32) -> (i32, i32) {
    %c0_i32 = arith.constant 0 : i32
    %c0_i32_0 = arith.constant 0 : i32
    return %arg0, %c0_i32 : i32, i32
  }
}

</mosaic_0001>

<bundles_post_ra>
// kernel: tpu_custom_call.1
= control target key start
LH: loop header
LB: loop body
LE: loop exit
PB: predicated region body
PF: predicated region fallthrough
CT: control target
= control target key end

     0   :  { %vm206_vm0 = vcmask 1043456   ;;  %vm61_vm1 = vcmask 31744   ;;  %s1425_s0 = inlined_call_operand.vmem [shape: f32[384,4], index: 0, kind: input, shape index: {}]   ;;  %s1426_s1 = inlined_call_operand.vmem [shape: f32[4,128], index: 1, kind: input, shape index: {}]   ;;  %s1427_s2 = inlined_call_operand.hbm [shape: bf16[384,128], index: 2, kind: output, shape index: {}]  }
   0x1   :  { %v60_v0 = vld [vmem:[%s1426_s1] sm:$0xf]  ;;  %v13_v3 = vld [vmem:[%s1425_s0 + $0x8] sm:$0xff]  ;;  %v14_v5 = vld [vmem:[%s1425_s0 + $0x10] sm:$0xff] }
   0x2   :  { %v12_v1 = vld [vmem:[%s1425_s0] sm:$0xff]  ;;  %1108 = vmatprep.subr.msk.mxu0 %vm206_vm0, %v60_v0  ;;  %1182 = vmatprep.subr.msk.mxu1 %vm206_vm0, %v60_v0  ;;  %v37_v4 = vld [vmem:[%s1425_s0 + $0xc8] sm:$0xff]  ;;  %v38_v6 = vld [vmem:[%s1425_s0 + $0xd0] sm:$0xff] }
   0x3   :  { %v36_v2 = vld [vmem:[%s1425_s0 + $0xc0] sm:$0xff]  ;;  %1109 = vmatpush3.msk.msra.mxu0 %vm206_vm0, %v60_v0  ;;  %1183 = vmatpush3.msk.msra.mxu1 %vm206_vm0, %v60_v0  ;;  %v15_v7 = vld [vmem:[%s1425_s0 + $0x18] sm:$0xff]  ;;  %v17_v11 = vld [vmem:[%s1425_s0 + $0x28] sm:$0xff] }
   0x4   :  { %1110 = vmatprep.mubr.msk.f32.mxu0 %vm61_vm1, %v12_v1  ;;  %1146 = vmatprep.mubr.msk.f32.mxu1 %vm61_vm1, %v36_v2  ;;  %v39_v8 = vld [vmem:[%s1425_s0 + $0xd8] sm:$0xff]  ;;  %v16_v9 = vld [vmem:[%s1425_s0 + $0x20] sm:$0xff]  ;;  %v41_v12 = vld [vmem:[%s1425_s0 + $0xe8] sm:$0xff] }
   0x5   :  { %1111 = vmatmul.mubr.msk.f32.vlgmr.msra.gmra.mxu0 %vm61_vm1, %v13_v3  ;;  %1147 = vmatmul.mubr.msk.f32.vlgmr.msra.gmra.mxu1 %vm61_vm1, %v37_v4  ;;  %v40_v10 = vld [vmem:[%s1425_s0 + $0xe0] sm:$0xff]  ;;  %v18_v13 = vld [vmem:[%s1425_s0 + $0x30] sm:$0xff]  ;;  %v19_v15 = vld [vmem:[%s1425_s0 + $0x38] sm:$0xff] }
   0x6   :  { %1113 = vmatprep.mubr.msk.f32.mxu0 %vm61_vm1, %v14_v5  ;;  %1149 = vmatprep.mubr.msk.f32.mxu1 %vm61_vm1, %v38_v6  ;;  %v42_v14 = vld [vmem:[%s1425_s0 + $0xf0] sm:$0xff]  ;;  %v43_v16 = vld [vmem:[%s1425_s0 + $0xf8] sm:$0xff]  ;;  %v20_v17 = vld [vmem:[%s1425_s0 + $0x40] sm:$0xff] }
   0x7   :  { %v44_v18 = vld [vmem:[%s1425_s0 + $0x100] sm:$0xff] }
   0x9   :  { %1114 = vmatmul.mubr.msk.f32.gmra.mxu0 %vm61_vm1, %v15_v7  ;;  %1150 = vmatmul.mubr.msk.f32.gmra.mxu1 %vm61_vm1, %v39_v8 }
   0xa   :  { %1116 = vmatprep.mubr.msk.f32.mxu0 %vm61_vm1, %v16_v9  ;;  %1152 = vmatprep.mubr.msk.f32.mxu1 %vm61_vm1, %v40_v10 }
   0xd   :  { %1117 = vmatmul.mubr.msk.f32.gmra.mxu0 %vm61_vm1, %v17_v11  ;;  %1153 = vmatmul.mubr.msk.f32.gmra.mxu1 %vm61_vm1, %v41_v12 }
   0xe   :  { %1119 = vmatprep.mubr.msk.f32.mxu0 %vm61_vm1, %v18_v13  ;;  %1155 = vmatprep.mubr.msk.f32.mxu1 %vm61_vm1, %v42_v14 }
  0x11   :  { %1120 = vmatmul.mubr.msk.f32.gmra.mxu0 %vm61_vm1, %v19_v15  ;;  %1156 = vmatmul.mubr.msk.f32.gmra.mxu1 %vm61_vm1, %v43_v16 }
  0x12   :  { %7 = vsyncpa [#allocation3], 0  ;;  %1122 = vmatprep.mubr.msk.f32.mxu0 %vm61_vm1, %v20_v17  ;;  %1158 = vmatprep.mubr.msk.f32.mxu1 %vm61_vm1, %v44_v18  ;;  %v21_v19 = vld [vmem:[%s1425_s0 + $0x48] sm:$0xff]  ;;  %v22_v21 = vld [vmem:[%s1425_s0 + $0x50] sm:$0xff] }
  0x13   :  { %v45_v20 = vld [vmem:[%s1425_s0 + $0x108] sm:$0xff]  ;;  %v46_v22 = vld [vmem:[%s1425_s0 + $0x110] sm:$0xff]  ;;  %v23_v23 = vld [vmem:[%s1425_s0 + $0x58] sm:$0xff] }
  0x14   :  { %v47_v24 = vld [vmem:[%s1425_s0 + $0x118] sm:$0xff]  ;;  %v24_v25 = vld [vmem:[%s1425_s0 + $0x60] sm:$0xff]  ;;  %v25_v27 = vld [vmem:[%s1425_s0 + $0x68] sm:$0xff] }
  0x15   :  { %1123 = vmatmul.mubr.msk.f32.gmra.mxu0 %vm61_vm1, %v21_v19  ;;  %1159 = vmatmul.mubr.msk.f32.gmra.mxu1 %vm61_vm1, %v45_v20  ;;  %v48_v26 = vld [vmem:[%s1425_s0 + $0x120] sm:$0xff]  ;;  %v49_v28 = vld [vmem:[%s1425_s0 + $0x128] sm:$0xff]  ;;  %v26_v29 = vld [vmem:[%s1425_s0 + $0x70] sm:$0xff] }
  0x16   :  { %1125 = vmatprep.mubr.msk.f32.mxu0 %vm61_vm1, %v22_v21  ;;  %1161 = vmatprep.mubr.msk.f32.mxu1 %vm61_vm1, %v46_v22  ;;  %v50_v30 = vld [vmem:[%s1425_s0 + $0x130] sm:$0xff]  ;;  %v27_v31 = vld [vmem:[%s1425_s0 + $0x78] sm:$0xff]  ;;  %v28_v33 = vld [vmem:[%s1425_s0 + $0x80] sm:$0xff] }
  0x17   :  { %v51_v32 = vld [vmem:[%s1425_s0 + $0x138] sm:$0xff]  ;;  %v52_v34 = vld [vmem:[%s1425_s0 + $0x140] sm:$0xff]  ;;  %v29_v35 = vld [vmem:[%s1425_s0 + $0x88] sm:$0xff] }
  0x18   :  { %v53_v36 = vld [vmem:[%s1425_s0 + $0x148] sm:$0xff]  ;;  %v30_v37 = vld [vmem:[%s1425_s0 + $0x90] sm:$0xff]  ;;  %v31_v39 = vld [vmem:[%s1425_s0 + $0x98] sm:$0xff] }
  0x19   :  { %1126 = vmatmul.mubr.msk.f32.gmra.mxu0 %vm61_vm1, %v23_v23  ;;  %1162 = vmatmul.mubr.msk.f32.gmra.mxu1 %vm61_vm1, %v47_v24  ;;  %v54_v38 = vld [vmem:[%s1425_s0 + $0x150] sm:$0xff]  ;;  %v55_v40 = vld [vmem:[%s1425_s0 + $0x158] sm:$0xff]  ;;  %v32_v41 = vld [vmem:[%s1425_s0 + $0xa0] sm:$0xff] }
  0x1a   :  { %1128 = vmatprep.mubr.msk.f32.mxu0 %vm61_vm1, %v24_v25  ;;  %1164 = vmatprep.mubr.msk.f32.mxu1 %vm61_vm1, %v48_v26  ;;  %v56_v42 = vld [vmem:[%s1425_s0 + $0x160] sm:$0xff]  ;;  %v33_v43 = vld [vmem:[%s1425_s0 + $0xa8] sm:$0xff]  ;;  %v34_v45 = vld [vmem:[%s1425_s0 + $0xb0] sm:$0xff] }
  0x1b   :  { %v57_v44 = vld [vmem:[%s1425_s0 + $0x168] sm:$0xff]  ;;  %v58_v46 = vld [vmem:[%s1425_s0 + $0x170] sm:$0xff]  ;;  %v35_v47 = vld [vmem:[%s1425_s0 + $0xb8] sm:$0xff] }
  0x1c   :  { %v59_v48 = vld [vmem:[%s1425_s0 + $0x178] sm:$0xff]  ;;  %s1209_s0 = smov [#allocation2]  }
  0x1d   :  { %1129 = vmatmul.mubr.msk.f32.gmra.mxu0 %vm61_vm1, %v25_v27  ;;  %1165 = vmatmul.mubr.msk.f32.gmra.mxu1 %vm61_vm1, %v49_v28  ;;  %s760_s19 = sshll.u32 %s1209_s0, 4  ;;  %s761_s19 = int_to_ptr.vmem [resolvable:$true] %s760_s19 }
  0x1e   :  { %1131 = vmatprep.mubr.msk.f32.mxu0 %vm61_vm1, %v26_v29  ;;  %1167 = vmatprep.mubr.msk.f32.mxu1 %vm61_vm1, %v50_v30  ;;  %s1187_s20 = scalar_lea.vmem %s761_s19, 3072  ;;  %p1192_p1 = scmp.lt.s32.totalorder %s761_s19, %s761_s19 }
  0x1f   :  { %p1188_p0 = scmp.ne.s32.totalorder %s761_s19, %s1187_s20  ;;  %p1193_p2 = scmp.lt.s32.totalorder %s1187_s20, %s1187_s20 }
  0x21   :  { %1132 = vmatmul.mubr.msk.f32.gmra.mxu0 %vm61_vm1, %v27_v31  ;;  %1168 = vmatmul.mubr.msk.f32.gmra.mxu1 %vm61_vm1, %v51_v32  ;;  %p1194_p3 = por %p1193_p2, %p1192_p1 }
  0x22   :  { %1134 = vmatprep.mubr.msk.f32.mxu0 %vm61_vm1, %v28_v33  ;;  %1170 = vmatprep.mubr.msk.f32.mxu1 %vm61_vm1, %v52_v34 }
  0x23   :  { %p1195_p4 = pnand %p1194_p3, %p1188_p0 }
  0x25   :  { %1135 = vmatmul.mubr.msk.f32.gmra.mxu0 %vm61_vm1, %v29_v35  ;;  %1171 = vmatmul.mubr.msk.f32.gmra.mxu1 %vm61_vm1, %v53_v36 }
  0x26   :  { %1137 = vmatprep.mubr.msk.f32.mxu0 %vm61_vm1, %v30_v37  ;;  %1173 = vmatprep.mubr.msk.f32.mxu1 %vm61_vm1, %v54_v38 }
  0x29   :  { %1138 = vmatmul.mubr.msk.f32.gmra.mxu0 %vm61_vm1, %v31_v39  ;;  %1174 = vmatmul.mubr.msk.f32.gmra.mxu1 %vm61_vm1, %v55_v40 }
  0x2a   :  { %1140 = vmatprep.mubr.msk.f32.mxu0 %vm61_vm1, %v32_v41  ;;  %1176 = vmatprep.mubr.msk.f32.mxu1 %vm61_vm1, %v56_v42 }
  0x2d   :  { %1141 = vmatmul.mubr.msk.f32.gmra.mxu0 %vm61_vm1, %v33_v43  ;;  %1177 = vmatmul.mubr.msk.f32.gmra.mxu1 %vm61_vm1, %v57_v44 }
  0x2e   :  { %1143 = vmatprep.mubr.msk.f32.mxu0 %vm61_vm1, %v34_v45  ;;  %1179 = vmatprep.mubr.msk.f32.mxu1 %vm61_vm1, %v58_v46 }
  0x31   :  { %1144 = vmatmul.mubr.msk.f32.gmra.mxu0 %vm61_vm1, %v35_v47  ;;  %1180 = vmatmul.mubr.msk.f32.gmra.mxu1 %vm61_vm1, %v59_v48 }
  0xc5   :  { %v1112_v49 = vpop.f32.mrf.mxu0  ;;  %v1148_v50 = vpop.f32.mrf.mxu1 }
  0xc7   :  { %v276_v51 = vpop.f32.mrf.mxu0  ;;  %v396_v52 = vpop.f32.mrf.mxu1 }
  0xc8   :  { %v919_v53 = vpack.c.bf16 %v1112_v49, %v276_v51  ;;  %v979_v54 = vpack.c.bf16 %v1148_v50, %v396_v52 }
  0xc9   :  { %v1115_v55 = vpop.f32.mrf.mxu0  ;;  %v1151_v56 = vpop.f32.mrf.mxu1 }
  0xca   :  { %920 = vst [vmem:[#allocation2] sm:$0xff] %v919_v53   ;;  %1047 = vst [vmem:[#allocation2 + $0x60] sm:$0xff] %v979_v54  }
  0xcb   :  { %v286_v57 = vpop.f32.mrf.mxu0  ;;  %v406_v58 = vpop.f32.mrf.mxu1 }
  0xcc   :  { %v924_v59 = vpack.c.bf16 %v1115_v55, %v286_v57  ;;  %v984_v60 = vpack.c.bf16 %v1151_v56, %v406_v58 }
  0xcd   :  { %v1118_v61 = vpop.f32.mrf.mxu0  ;;  %v1154_v62 = vpop.f32.mrf.mxu1 }
  0xce   :  { %1036 = vst [vmem:[#allocation2 + $0x8] sm:$0xff] %v924_v59   ;;  %1048 = vst [vmem:[#allocation2 + $0x68] sm:$0xff] %v984_v60  }
  0xcf   :  { %v296_v63 = vpop.f32.mrf.mxu0  ;;  %v416_v0 = vpop.f32.mrf.mxu1 }
  0xd0   :  { %v929_v1 = vpack.c.bf16 %v1118_v61, %v296_v63  ;;  %v989_v2 = vpack.c.bf16 %v1154_v62, %v416_v0 }
  0xd1   :  { %v1121_v3 = vpop.f32.mrf.mxu0  ;;  %v1157_v4 = vpop.f32.mrf.mxu1 }
  0xd2   :  { %1037 = vst [vmem:[#allocation2 + $0x10] sm:$0xff] %v929_v1   ;;  %1049 = vst [vmem:[#allocation2 + $0x70] sm:$0xff] %v989_v2  }
  0xd3   :  { %v306_v5 = vpop.f32.mrf.mxu0  ;;  %v426_v6 = vpop.f32.mrf.mxu1 }
  0xd4   :  { %v934_v7 = vpack.c.bf16 %v1121_v3, %v306_v5  ;;  %v994_v8 = vpack.c.bf16 %v1157_v4, %v426_v6 }
  0xd5   :  { %v1124_v9 = vpop.f32.mrf.mxu0  ;;  %v1160_v10 = vpop.f32.mrf.mxu1 }
  0xd6   :  { %1038 = vst [vmem:[#allocation2 + $0x18] sm:$0xff] %v934_v7   ;;  %1050 = vst [vmem:[#allocation2 + $0x78] sm:$0xff] %v994_v8  }
  0xd7   :  { %v316_v11 = vpop.f32.mrf.mxu0  ;;  %v436_v12 = vpop.f32.mrf.mxu1 }
  0xd8   :  { %v939_v13 = vpack.c.bf16 %v1124_v9, %v316_v11  ;;  %v999_v14 = vpack.c.bf16 %v1160_v10, %v436_v12 }
  0xd9   :  { %v1127_v15 = vpop.f32.mrf.mxu0  ;;  %v1163_v16 = vpop.f32.mrf.mxu1 }
  0xda   :  { %1039 = vst [vmem:[#allocation2 + $0x20] sm:$0xff] %v939_v13   ;;  %1051 = vst [vmem:[#allocation2 + $0x80] sm:$0xff] %v999_v14  }
  0xdb   :  { %v326_v17 = vpop.f32.mrf.mxu0  ;;  %v446_v18 = vpop.f32.mrf.mxu1 }
  0xdc   :  { %v944_v19 = vpack.c.bf16 %v1127_v15, %v326_v17  ;;  %v1004_v20 = vpack.c.bf16 %v1163_v16, %v446_v18 }
  0xdd   :  { %v1130_v21 = vpop.f32.mrf.mxu0  ;;  %v1166_v22 = vpop.f32.mrf.mxu1 }
  0xde   :  { %1040 = vst [vmem:[#allocation2 + $0x28] sm:$0xff] %v944_v19   ;;  %1052 = vst [vmem:[#allocation2 + $0x88] sm:$0xff] %v1004_v20  }
  0xdf   :  { %v336_v23 = vpop.f32.mrf.mxu0  ;;  %v456_v24 = vpop.f32.mrf.mxu1 }
  0xe0   :  { %v949_v25 = vpack.c.bf16 %v1130_v21, %v336_v23  ;;  %v1009_v26 = vpack.c.bf16 %v1166_v22, %v456_v24 }
  0xe1   :  { %v1133_v27 = vpop.f32.mrf.mxu0  ;;  %v1169_v28 = vpop.f32.mrf.mxu1 }
  0xe2   :  { %1041 = vst [vmem:[#allocation2 + $0x30] sm:$0xff] %v949_v25   ;;  %1053 = vst [vmem:[#allocation2 + $0x90] sm:$0xff] %v1009_v26  }
  0xe3   :  { %v346_v29 = vpop.f32.mrf.mxu0  ;;  %v466_v30 = vpop.f32.mrf.mxu1 }
  0xe4   :  { %v954_v31 = vpack.c.bf16 %v1133_v27, %v346_v29  ;;  %v1014_v32 = vpack.c.bf16 %v1169_v28, %v466_v30 }
  0xe5   :  { %v1136_v33 = vpop.f32.mrf.mxu0  ;;  %v1172_v34 = vpop.f32.mrf.mxu1 }
  0xe6   :  { %1042 = vst [vmem:[#allocation2 + $0x38] sm:$0xff] %v954_v31   ;;  %1054 = vst [vmem:[#allocation2 + $0x98] sm:$0xff] %v1014_v32  }
  0xe7   :  { %v356_v35 = vpop.f32.mrf.mxu0  ;;  %v476_v36 = vpop.f32.mrf.mxu1 }
  0xe8   :  { %v959_v37 = vpack.c.bf16 %v1136_v33, %v356_v35  ;;  %v1019_v38 = vpack.c.bf16 %v1172_v34, %v476_v36 }
  0xe9   :  { %v1139_v39 = vpop.f32.mrf.mxu0  ;;  %v1175_v40 = vpop.f32.mrf.mxu1 }
  0xea   :  { %1043 = vst [vmem:[#allocation2 + $0x40] sm:$0xff] %v959_v37   ;;  %1055 = vst [vmem:[#allocation2 + $0xa0] sm:$0xff] %v1019_v38  }
  0xeb   :  { %v366_v41 = vpop.f32.mrf.mxu0  ;;  %v486_v42 = vpop.f32.mrf.mxu1 }
  0xec   :  { %v964_v43 = vpack.c.bf16 %v1139_v39, %v366_v41  ;;  %v1024_v44 = vpack.c.bf16 %v1175_v40, %v486_v42 }
  0xed   :  { %v1142_v45 = vpop.f32.mrf.mxu0  ;;  %v1178_v46 = vpop.f32.mrf.mxu1 }
  0xee   :  { %1044 = vst [vmem:[#allocation2 + $0x48] sm:$0xff] %v964_v43   ;;  %1056 = vst [vmem:[#allocation2 + $0xa8] sm:$0xff] %v1024_v44  }
  0xef   :  { %v376_v47 = vpop.f32.mrf.mxu0  ;;  %v496_v48 = vpop.f32.mrf.mxu1 }
  0xf0   :  { %v969_v49 = vpack.c.bf16 %v1142_v45, %v376_v47  ;;  %v1029_v50 = vpack.c.bf16 %v1178_v46, %v496_v48 }
  0xf1   :  { %v1145_v51 = vpop.f32.mrf.mxu0  ;;  %v1181_v52 = vpop.f32.mrf.mxu1 }
  0xf2   :  { %1045 = vst [vmem:[#allocation2 + $0x50] sm:$0xff] %v969_v49   ;;  %1057 = vst [vmem:[#allocation2 + $0xb0] sm:$0xff] %v1029_v50  }
  0xf3   :  { %v386_v53 = vpop.f32.mrf.mxu0  ;;  %v506_v54 = vpop.f32.mrf.mxu1 }
  0xf4   :  { %v974_v55 = vpack.c.bf16 %v1145_v51, %v386_v53  ;;  %v1034_v56 = vpack.c.bf16 %v1181_v52, %v506_v54 }
  0xf6   :  { %1046 = vst [vmem:[#allocation2 + $0x58] sm:$0xff] %v974_v55   ;;  %1058 = vst [vmem:[#allocation2 + $0xb8] sm:$0xff] %v1034_v56  }
  0xf7   :  { %1198 = shalt.err (!%p1195_p4)
}
  0xf8   :  { %s1210_s21 = smov 64   ;;  %s1211_s22 = smov 4  }
  0xf9   :  { %766 = dma.vmem_to_hbm [thread:$0]  %s761_s19, 3072, %s1427_s2, [#allocation3], %s1210_s21, %s1210_s21, %s1211_s22  }
  0xfa   :  { %1207 = dma.done.wait [#allocation3], 3072  }
  0xfb   :  { %1208 = vsyncadd [#allocation3], 4294964224 }
  0xfc   :  { %770 = vsyncpa [#allocation3], 1 }

</bundles_post_ra>
